<compile_context>
chip_gen: v7x
topology: tpu7x:2x2x1
jax: 0.10.0
libtpu: 0.0.40
codegen_flags: <defaults>
</compile_context>

<pallas_src>
import functools
import math

import jax
import jax.numpy as jnp
import numpy as np
from jax import lax
from jax.experimental import pallas as pl
from jax.experimental.pallas import tpu as pltpu

BN_EPS = 1e-5  # PyTorch BatchNorm2d default


def _round_up(x, m):
    return (x + m - 1) // m * m


def _pick_tile_rows(H, W, requested=None, target_lanes=1024):
    """Output rows per tile: TH*W multiple of 128 (lane-dense), ~target_lanes lanes,
    and (when possible) TH | H so there is no grid padding / output crop."""
    g = 128 // math.gcd(W, 128)          # smallest TH giving lane-dense tiles
    if requested is not None:
        th = _round_up(max(int(requested), 1), g)
        return min(th, _round_up(H, g))
    th = _round_up(max(-(-target_lanes // W), 1), g)
    th = min(th, _round_up(H, g))
    if H % g == 0:
        divisors = [t for t in range(g, th + 1, g) if H % t == 0]
        if divisors:
            th = divisors[-1]
    return th


def _pick_vmem_limit():
    """~70% of physical VMEM, capped at 96 MiB (v5e/v6e); ~44 MiB on v7x (64 MiB phys)."""
    try:
        cap = int(pltpu.get_tpu_info().vmem_capacity_bytes)
    except Exception:                    # conservative fallback
        cap = 64 * 1024 * 1024
    return int(min(96 * 1024 * 1024, cap * 7 // 10))


def conv_block_forward(x, weight, gamma, beta, *, kernel_size, dilation,
                       tile_rows=None, eps=BN_EPS):
    """ConvBlock forward: Conv2d(stride=1, bias=False) -> BatchNorm2d(train) -> ReLU.

    x: (N, Cin, H, W), weight: (Cout, Cin, KH, KW), gamma/beta: (Cout,)
    Returns (N, Cout, H, W) in x.dtype.
    """
    N, Cin, H, W = x.shape
    Cout = weight.shape[0]
    KH, KW = kernel_size
    dh, dw = dilation
    if KH % 2 == 0 or KW % 2 == 0:
        raise NotImplementedError("odd kernel sizes only ('same'-shaped output)")
    ph, pw = (KH - 1) // 2 * dh, (KW - 1) // 2 * dw

    TH = _pick_tile_rows(H, W, tile_rows)          # output rows per tile
    Hg = _round_up(H, TH)                          # grid-padded output rows
    n_tiles = Hg // TH
    TM = TH * W                                    # lanes per tile (multiple of 128)
    Cout_p = _round_up(Cout, 8)                    # sublane-aligned output channels
    KWC = KW * Cin                                 # width taps folded into the K rows
    K = KH * KWC                                   # full contraction dim (no padding)
    BH = TH + 2 * ph                               # halo'd band height ((KH-1)*dh == 2*ph)
    BHW = BH * W
    Hp = Hg + 2 * ph

    # ---- wrapper glue (plain XLA): pad+cast, width-tap expansion, halo'd row bands ----
    # Activation is duplicated ~KW x (+halo) here; in exchange the in-kernel im2col is
    # KH dense, reshape-free slab copies with no masked stores.
    x_pad = jnp.pad(x, ((0, 0), (0, 0), (ph, ph + (Hg - H)), (pw, pw))).astype(jnp.bfloat16)
    # width-tap expansion, kw-major / Cin-minor -> matches the weight K ordering below
    x_taps = jnp.concatenate([x_pad[:, :, :, kw * dw:kw * dw + W] for kw in range(KW)],
                             axis=1)                                   # (N, KWC, Hp, W)
    # halo'd, spatially flattened row bands: band t covers padded rows [t*TH, t*TH + BH)
    rows = (jnp.arange(n_tiles)[:, None] * TH + jnp.arange(BH)[None, :]).reshape(-1)
    x_bands = jnp.take(x_taps, rows, axis=2).reshape(N, KWC, n_tiles, BH, W)
    x_bands = x_bands.transpose(0, 2, 1, 3, 4).reshape(N, n_tiles, KWC, BHW)

    # weight rows ordered (kh, kw, ci) to match the band/patch layout
    w_mat = weight.transpose(0, 2, 3, 1).reshape(Cout, K)
    w_mat = jnp.pad(w_mat, ((0, Cout_p - Cout), (0, 0))).astype(jnp.bfloat16)

    grid = (N, n_tiles)
    w_spec = pl.BlockSpec((Cout_p, K), lambda n, t: (0, 0))            # loaded once
    x_spec = pl.BlockSpec((1, 1, KWC, BHW), lambda n, t: (n, t, 0, 0))  # halo'd band
    col_spec = pl.BlockSpec((Cout_p, 1), lambda n, t: (0, 0))
    stat_spec = pl.BlockSpec((1, Cout_p, 1), lambda n, t: (n, 0, 0))    # per-batch partials
    patch_scratch = pltpu.VMEM((K, TM), jnp.bfloat16)
    vmem_limit = _pick_vmem_limit()

    def _conv_tile(w_ref, x_ref, pat_ref):
        """im2col as KH dense slab copies (one per kh tap), then one MXU matmul."""
        for kh in range(KH):                       # static, tiny trip count
            off = kh * dh * W                      # static lane offset into the band
            pat_ref[kh * KWC:(kh + 1) * KWC, :] = x_ref[0, 0, :, off:off + TM]
        return jnp.dot(w_ref[...], pat_ref[...],
                       preferred_element_type=jnp.float32)   # (Cout_p, TM) f32

    # ------------- pass 1: per-channel, per-batch sum / sum-of-squares ---------------
    def stats_kernel(w_ref, x_ref, psum_ref, psq_ref, pat_ref):
        @pl.when(pl.program_id(1) == 0)
        def _init():
            psum_ref[...] = jnp.zeros_like(psum_ref)
            psq_ref[...] = jnp.zeros_like(psq_ref)

        conv = _conv_tile(w_ref, x_ref, pat_ref)
        if Hg != H:                                # mask rows added by grid padding
            t = pl.program_id(1)
            col = lax.broadcasted_iota(jnp.int32, conv.shape, 1)
            valid = jnp.minimum(H - t * TH, TH) * W
            conv = jnp.where(col < valid, conv, 0.0)
        psum_ref[0] += jnp.sum(conv, axis=1, keepdims=True)
        psq_ref[0] += jnp.sum(conv * conv, axis=1, keepdims=True)

    flops = int(2 * Cout_p * K * N * Hg * W)
    in_bytes = int(x_bands.size * 2 + w_mat.size * 2)
    out_bytes = int(N * Cout_p * Hg * W * x.dtype.itemsize)

    part_sum, part_sq = pl.pallas_call(
        stats_kernel,
        out_shape=(jax.ShapeDtypeStruct((N, Cout_p, 1), jnp.float32),
                   jax.ShapeDtypeStruct((N, Cout_p, 1), jnp.float32)),
        grid=grid,
        in_specs=[w_spec, x_spec],
        out_specs=(stat_spec, stat_spec),
        scratch_shapes=[patch_scratch],
        compiler_params=pltpu.CompilerParams(
            dimension_semantics=("parallel", "arbitrary"),   # batch-parallel stats
            vmem_limit_bytes=vmem_limit),
        cost_estimate=pl.CostEstimate(flops=flops, transcendentals=0,
                                      bytes_accessed=in_bytes + 8 * N * Cout_p),
    )(w_mat, x_bands)

    # ---- finalize BN: fold batch stats + affine into one per-channel FMA ------------
    m_count = float(N * H * W)
    ch_sum = part_sum.sum(axis=0)                  # (Cout_p, 1)
    ch_sq = part_sq.sum(axis=0)
    mean = ch_sum / m_count
    var = jnp.maximum(ch_sq / m_count - mean * mean, 0.0)    # biased (train mode)
    gamma_p = jnp.pad(gamma.astype(jnp.float32), (0, Cout_p - Cout)).reshape(Cout_p, 1)
    beta_p = jnp.pad(beta.astype(jnp.float32), (0, Cout_p - Cout)).reshape(Cout_p, 1)
    scale = gamma_p * lax.rsqrt(var + eps)
    shift = beta_p - mean * scale

    # ------------- pass 2: conv -> per-channel FMA -> ReLU ---------------------------
    def norm_kernel(w_ref, x_ref, scale_ref, shift_ref, o_ref, pat_ref):
        conv = _conv_tile(w_ref, x_ref, pat_ref)
        y = conv * scale_ref[...] + shift_ref[...]
        o_ref[0] = jnp.maximum(y, 0.0).astype(o_ref.dtype)

    out_spec = pl.BlockSpec((1, Cout_p, TM), lambda n, t: (n, 0, t))   # lane-dense

    out_flat = pl.pallas_call(
        norm_kernel,
        out_shape=jax.ShapeDtypeStruct((N, Cout_p, Hg * W), x.dtype),
        grid=grid,
        in_specs=[w_spec, x_spec, col_spec, col_spec],
        out_specs=out_spec,
        scratch_shapes=[patch_scratch],
        compiler_params=pltpu.CompilerParams(
            dimension_semantics=("parallel", "parallel"),    # shard across TCs (v7x)
            vmem_limit_bytes=vmem_limit),
        cost_estimate=pl.CostEstimate(flops=flops, transcendentals=0,
                                      bytes_accessed=in_bytes + out_bytes),
    )(w_mat, x_bands, scale, shift)

    # Channel-major + flat spatial: NCHW is a free reshape unless padding must be cropped.
    if Cout_p != Cout or Hg != H:
        out_flat = out_flat[:, :Cout, :H * W]
    return out_flat.reshape(N, Cout, H, W)


def reference_forward(x, weight, gamma, beta, kernel_size, dilation,
                      eps=BN_EPS, matmul_dtype=None):
    """Plain-JAX reference matching PyTorch ConvBlock forward (train-mode BN)."""
    ph = (kernel_size[0] - 1) // 2 * dilation[0]
    pw = (kernel_size[1] - 1) // 2 * dilation[1]
    xw, ww = x, weight
    if matmul_dtype is not None:
        xw, ww = x.astype(matmul_dtype), weight.astype(matmul_dtype)
    dn = lax.conv_dimension_numbers(x.shape, weight.shape, ("NCHW", "OIHW", "NCHW"))
    conv = lax.conv_general_dilated(
        xw, ww, window_strides=(1, 1), padding=((ph, ph), (pw, pw)),
        rhs_dilation=dilation, dimension_numbers=dn,
        preferred_element_type=jnp.float32)
    mean = conv.mean(axis=(0, 2, 3), keepdims=True)
    var = ((conv - mean) ** 2).mean(axis=(0, 2, 3), keepdims=True)
    y = (conv - mean) * lax.rsqrt(var + eps)
    y = y * gamma.reshape(1, -1, 1, 1) + beta.reshape(1, -1, 1, 1)
    return jnp.maximum(y, 0.0).astype(x.dtype)


if __name__ == "__main__":
    def run_case(N, Cin, Cout, H, W, kernel_size, dilation, tile_rows):
        key = jax.random.PRNGKey(0)
        kx, kw_key = jax.random.split(key)
        x = jax.random.normal(kx, (N, Cin, H, W), dtype=jnp.float32)
        fan_in = Cin * kernel_size[0] * kernel_size[1]
        weight = jax.random.normal(kw_key, (Cout, Cin, *kernel_size), dtype=jnp.float32)
        weight = weight / jnp.sqrt(jnp.float32(fan_in))
        gamma = jnp.ones((Cout,), dtype=jnp.float32)   # BatchNorm2d default init
        beta = jnp.zeros((Cout,), dtype=jnp.float32)

        fwd = jax.jit(functools.partial(conv_block_forward, kernel_size=kernel_size,
                                        dilation=dilation, tile_rows=tile_rows))
        out = jax.block_until_ready(fwd(x, weight, gamma, beta))

        # Kernel uses bf16 MXU operands: tight check vs. a same-precision reference,
        # loose check vs. the full-f32 reference.
        ref_bf16 = reference_forward(x, weight, gamma, beta, kernel_size, dilation,
                                     matmul_dtype=jnp.bfloat16)
        np.testing.assert_allclose(np.asarray(out), np.asarray(ref_bf16),
                                   rtol=2e-3, atol=2e-3)
        ref_f32 = reference_forward(x, weight, gamma, beta, kernel_size, dilation)
        np.testing.assert_allclose(np.asarray(out), np.asarray(ref_f32),
                                   rtol=5e-2, atol=5e-2)

    # Case 1: TH | H (no grid padding or crop), (2, 2) grid, dilated rows -> exercises
    # pipelining and the cross-tile BN statistics accumulation.
    run_case(2, 4, 8, 16, 16, (3, 3), (2, 1), tile_rows=8)
    # Case 2: H not a multiple of the tile -> exercises grid-pad masking in the stats
    # pass and the output-crop path, with width dilation.
    run_case(2, 4, 8, 12, 16, (3, 3), (1, 2), tile_rows=8)

    print("KERNEL_OK")
</pallas_src>

<mosaic_0001>
module attributes {stable_mosaic.version = 11 : i64} {
  func.func @stats_kernel(%arg0: i32, %arg1: i32, %arg2: memref<8x36xbf16, #tpu.memory_space<vmem>>, %arg3: memref<1x1x12x192xbf16, #tpu.memory_space<vmem>>, %arg4: memref<1x8x1xf32, #tpu.memory_space<vmem>>, %arg5: memref<1x8x1xf32, #tpu.memory_space<vmem>>, %arg6: memref<36x128xbf16, #tpu.memory_space<vmem>>) attributes {dimension_semantics = [#tpu.dimension_semantics<parallel>, #tpu.dimension_semantics<arbitrary>], iteration_bounds = array<i64: 2, 2>, scalar_prefetch = 0 : i64, scratch_operands = 1 : i64, tpu.core_type = #tpu.core_type<tc>, window_params = [{pipeline_mode = #tpu.pipeline_mode<synchronous>, transform_indices = @transform_0, window_bounds = array<i64: 8, 36>}, {transform_indices = @transform_1, window_bounds = array<i64: 1, 1, 12, 192>}, {transform_indices = @transform_2, window_bounds = array<i64: 1, 8, 1>}, {transform_indices = @transform_3, window_bounds = array<i64: 1, 8, 1>}]} {
    %c0_i32 = arith.constant 0 : i32
    %0 = arith.cmpi eq, %arg1, %c0_i32 : i32
    %1 = arith.extui %0 : i1 to i32
    %c0_i32_0 = arith.constant 0 : i32
    %2 = arith.cmpi ne, %1, %c0_i32_0 : i32
    scf.if %2 {
      %cst_32 = arith.constant 0.000000e+00 : f32
      %32 = vector.broadcast %cst_32 : f32 to vector<1x8x1xf32>
      %c0_33 = arith.constant 0 : index
      %c0_34 = arith.constant 0 : index
      %c0_35 = arith.constant 0 : index
      %33 = vector.load %arg4[%c0_33, %c0_34, %c0_35] : memref<1x8x1xf32, #tpu.memory_space<vmem>>, vector<1x8x1xf32>
      tpu.vector_store %arg4[%c0_33, %c0_34, %c0_35], %32 {strides = array<i32>} : memref<1x8x1xf32, #tpu.memory_space<vmem>>, vector<1x8x1xf32>,
      %cst_36 = arith.constant 0.000000e+00 : f32
      %34 = vector.broadcast %cst_36 : f32 to vector<1x8x1xf32>
      %c0_37 = arith.constant 0 : index
      %c0_38 = arith.constant 0 : index
      %c0_39 = arith.constant 0 : index
      %35 = vector.load %arg5[%c0_37, %c0_38, %c0_39] : memref<1x8x1xf32, #tpu.memory_space<vmem>>, vector<1x8x1xf32>
      tpu.vector_store %arg5[%c0_37, %c0_38, %c0_39], %34 {strides = array<i32>} : memref<1x8x1xf32, #tpu.memory_space<vmem>>, vector<1x8x1xf32>,
    } else {
    }
    %c0 = arith.constant 0 : index
    %c0_1 = arith.constant 0 : index
    %c0_2 = arith.constant 0 : index
    %c0_3 = arith.constant 0 : index
    %3 = vector.load %arg3[%c0, %c0_1, %c0_2, %c0_3] : memref<1x1x12x192xbf16, #tpu.memory_space<vmem>>, vector<1x1x12x128xbf16>
    %4 = vector.shape_cast %3 : vector<1x1x12x128xbf16> to vector<12x128xbf16>
    %c0_4 = arith.constant 0 : index
    %c0_5 = arith.constant 0 : index
    %5 = vector.load %arg6[%c0_4, %c0_5] : memref<36x128xbf16, #tpu.memory_space<vmem>>, vector<12x128xbf16>
    tpu.vector_store %arg6[%c0_4, %c0_5], %4 {strides = array<i32>} : memref<36x128xbf16, #tpu.memory_space<vmem>>, vector<12x128xbf16>,
    %c0_6 = arith.constant 0 : index
    %c0_7 = arith.constant 0 : index
    %c0_8 = arith.constant 0 : index
    %c32 = arith.constant 32 : index
    %6 = vector.load %arg3[%c0_6, %c0_7, %c0_8, %c32] : memref<1x1x12x192xbf16, #tpu.memory_space<vmem>>, vector<1x1x12x128xbf16>
    %7 = vector.shape_cast %6 : vector<1x1x12x128xbf16> to vector<12x128xbf16>
    %c12 = arith.constant 12 : index
    %c0_9 = arith.constant 0 : index
    %8 = vector.load %arg6[%c12, %c0_9] : memref<36x128xbf16, #tpu.memory_space<vmem>>, vector<12x128xbf16>
    tpu.vector_store %arg6[%c12, %c0_9], %7 {strides = array<i32>} : memref<36x128xbf16, #tpu.memory_space<vmem>>, vector<12x128xbf16>,
    %c0_10 = arith.constant 0 : index
    %c0_11 = arith.constant 0 : index
    %c0_12 = arith.constant 0 : index
    %c64 = arith.constant 64 : index
    %9 = vector.load %arg3[%c0_10, %c0_11, %c0_12, %c64] : memref<1x1x12x192xbf16, #tpu.memory_space<vmem>>, vector<1x1x12x128xbf16>
    %10 = vector.shape_cast %9 : vector<1x1x12x128xbf16> to vector<12x128xbf16>
    %c24 = arith.constant 24 : index
    %c0_13 = arith.constant 0 : index
    %11 = vector.load %arg6[%c24, %c0_13] : memref<36x128xbf16, #tpu.memory_space<vmem>>, vector<12x128xbf16>
    tpu.vector_store %arg6[%c24, %c0_13], %10 {strides = array<i32>} : memref<36x128xbf16, #tpu.memory_space<vmem>>, vector<12x128xbf16>,
    %c0_14 = arith.constant 0 : index
    %c0_15 = arith.constant 0 : index
    %12 = vector.load %arg2[%c0_14, %c0_15] : memref<8x36xbf16, #tpu.memory_space<vmem>>, vector<8x36xbf16>
    %c0_16 = arith.constant 0 : index
    %c0_17 = arith.constant 0 : index
    %13 = vector.load %arg6[%c0_16, %c0_17] : memref<36x128xbf16, #tpu.memory_space<vmem>>, vector<36x128xbf16>
    %cst = arith.constant dense<0.000000e+00> : vector<8x128xf32>
    %14 = tpu.matmul %12, %13, %cst {dimension_numbers = #tpu.dot_dimension_numbers<[1], [0], [0], [1], [0, 0, 1, 1], [], []>} : vector<8x36xbf16>, vector<36x128xbf16>, vector<8x128xf32> -> vector<8x128xf32>
    %c0_18 = arith.constant 0 : index
    %c0_19 = arith.constant 0 : index
    %c0_20 = arith.constant 0 : index
    %15 = vector.load %arg4[%c0_18, %c0_19, %c0_20] : memref<1x8x1xf32, #tpu.memory_space<vmem>>, vector<1x8x1xf32>
    %16 = vector.shape_cast %15 : vector<1x8x1xf32> to vector<8x1xf32>
    %cst_21 = arith.constant dense<0.000000e+00> : vector<8xf32>
    %17 = vector.multi_reduction <add>, %14, %cst_21 [1] : vector<8x128xf32> to vector<8xf32>
    %18 = vector.shape_cast %17 : vector<8xf32> to vector<8x1xf32>
    %19 = arith.addf %16, %18 : vector<8x1xf32>
    %c0_22 = arith.constant 0 : index
    %c0_23 = arith.constant 0 : index
    %c0_24 = arith.constant 0 : index
    %20 = vector.load %arg4[%c0_22, %c0_23, %c0_24] : memref<1x8x1xf32, #tpu.memory_space<vmem>>, vector<1x8x1xf32>
    %21 = vector.shape_cast %20 : vector<1x8x1xf32> to vector<8x1xf32>
    %22 = vector.shape_cast %19 : vector<8x1xf32> to vector<1x8x1xf32>
    tpu.vector_store %arg4[%c0_22, %c0_23, %c0_24], %22 {strides = array<i32>} : memref<1x8x1xf32, #tpu.memory_space<vmem>>, vector<1x8x1xf32>,
    %c0_25 = arith.constant 0 : index
    %c0_26 = arith.constant 0 : index
    %c0_27 = arith.constant 0 : index
    %23 = vector.load %arg5[%c0_25, %c0_26, %c0_27] : memref<1x8x1xf32, #tpu.memory_space<vmem>>, vector<1x8x1xf32>
    %24 = vector.shape_cast %23 : vector<1x8x1xf32> to vector<8x1xf32>
    %25 = arith.mulf %14, %14 : vector<8x128xf32>
    %cst_28 = arith.constant dense<0.000000e+00> : vector<8xf32>
    %26 = vector.multi_reduction <add>, %25, %cst_28 [1] : vector<8x128xf32> to vector<8xf32>
    %27 = vector.shape_cast %26 : vector<8xf32> to vector<8x1xf32>
    %28 = arith.addf %24, %27 : vector<8x1xf32>
    %c0_29 = arith.constant 0 : index
    %c0_30 = arith.constant 0 : index
    %c0_31 = arith.constant 0 : index
    %29 = vector.load %arg5[%c0_29, %c0_30, %c0_31] : memref<1x8x1xf32, #tpu.memory_space<vmem>>, vector<1x8x1xf32>
    %30 = vector.shape_cast %29 : vector<1x8x1xf32> to vector<8x1xf32>
    %31 = vector.shape_cast %28 : vector<8x1xf32> to vector<1x8x1xf32>
    tpu.vector_store %arg5[%c0_29, %c0_30, %c0_31], %31 {strides = array<i32>} : memref<1x8x1xf32, #tpu.memory_space<vmem>>, vector<1x8x1xf32>,
    return
  }
  func.func @transform_0(%arg0: i32, %arg1: i32) -> (i32, i32) {
    %c0_i32 = arith.constant 0 : i32
    %c0_i32_0 = arith.constant 0 : i32
    %c0_i32_1 = arith.constant 0 : i32
    return %c0_i32, %c0_i32_0 : i32, i32
  }
  func.func @transform_1(%arg0: i32, %arg1: i32) -> (i32, i32, i32, i32) {
    %c0_i32 = arith.constant 0 : i32
    %c0_i32_0 = arith.constant 0 : i32
    %c0_i32_1 = arith.constant 0 : i32
    return %arg0, %arg1, %c0_i32, %c0_i32_0 : i32, i32, i32, i32
  }
  func.func @transform_2(%arg0: i32, %arg1: i32) -> (i32, i32, i32) {
    %c0_i32 = arith.constant 0 : i32
    %c0_i32_0 = arith.constant 0 : i32
    %c0_i32_1 = arith.constant 0 : i32
    return %arg0, %c0_i32, %c0_i32_0 : i32, i32, i32
  }
  func.func @transform_3(%arg0: i32, %arg1: i32) -> (i32, i32, i32) {
    %c0_i32 = arith.constant 0 : i32
    %c0_i32_0 = arith.constant 0 : i32
    %c0_i32_1 = arith.constant 0 : i32
    return %arg0, %c0_i32, %c0_i32_0 : i32, i32, i32
  }
}

module attributes {stable_mosaic.version = 11 : i64} {
  func.func @norm_kernel(%arg0: i32, %arg1: i32, %arg2: memref<8x36xbf16, #tpu.memory_space<vmem>>, %arg3: memref<1x1x12x192xbf16, #tpu.memory_space<vmem>>, %arg4: memref<8x1xf32, #tpu.memory_space<vmem>>, %arg5: memref<8x1xf32, #tpu.memory_space<vmem>>, %arg6: memref<1x8x128xf32, #tpu.memory_space<vmem>>, %arg7: memref<36x128xbf16, #tpu.memory_space<vmem>>) attributes {dimension_semantics = [#tpu.dimension_semantics<parallel>, #tpu.dimension_semantics<parallel>], iteration_bounds = array<i64: 2, 2>, scalar_prefetch = 0 : i64, scratch_operands = 1 : i64, tpu.core_type = #tpu.core_type<tc>, window_params = [{pipeline_mode = #tpu.pipeline_mode<synchronous>, transform_indices = @transform_0, window_bounds = array<i64: 8, 36>}, {transform_indices = @transform_1, window_bounds = array<i64: 1, 1, 12, 192>}, {pipeline_mode = #tpu.pipeline_mode<synchronous>, transform_indices = @transform_2, window_bounds = array<i64: 8, 1>}, {pipeline_mode = #tpu.pipeline_mode<synchronous>, transform_indices = @transform_3, window_bounds = array<i64: 8, 1>}, {transform_indices = @transform_4, window_bounds = array<i64: 1, 8, 128>}]} {
    %c0 = arith.constant 0 : index
    %c0_0 = arith.constant 0 : index
    %c0_1 = arith.constant 0 : index
    %c0_2 = arith.constant 0 : index
    %0 = vector.load %arg3[%c0, %c0_0, %c0_1, %c0_2] : memref<1x1x12x192xbf16, #tpu.memory_space<vmem>>, vector<1x1x12x128xbf16>
    %1 = vector.shape_cast %0 : vector<1x1x12x128xbf16> to vector<12x128xbf16>
    %c0_3 = arith.constant 0 : index
    %c0_4 = arith.constant 0 : index
    %2 = vector.load %arg7[%c0_3, %c0_4] : memref<36x128xbf16, #tpu.memory_space<vmem>>, vector<12x128xbf16>
    tpu.vector_store %arg7[%c0_3, %c0_4], %1 {strides = array<i32>} : memref<36x128xbf16, #tpu.memory_space<vmem>>, vector<12x128xbf16>,
    %c0_5 = arith.constant 0 : index
    %c0_6 = arith.constant 0 : index
    %c0_7 = arith.constant 0 : index
    %c32 = arith.constant 32 : index
    %3 = vector.load %arg3[%c0_5, %c0_6, %c0_7, %c32] : memref<1x1x12x192xbf16, #tpu.memory_space<vmem>>, vector<1x1x12x128xbf16>
    %4 = vector.shape_cast %3 : vector<1x1x12x128xbf16> to vector<12x128xbf16>
    %c12 = arith.constant 12 : index
    %c0_8 = arith.constant 0 : index
    %5 = vector.load %arg7[%c12, %c0_8] : memref<36x128xbf16, #tpu.memory_space<vmem>>, vector<12x128xbf16>
    tpu.vector_store %arg7[%c12, %c0_8], %4 {strides = array<i32>} : memref<36x128xbf16, #tpu.memory_space<vmem>>, vector<12x128xbf16>,
    %c0_9 = arith.constant 0 : index
    %c0_10 = arith.constant 0 : index
    %c0_11 = arith.constant 0 : index
    %c64 = arith.constant 64 : index
    %6 = vector.load %arg3[%c0_9, %c0_10, %c0_11, %c64] : memref<1x1x12x192xbf16, #tpu.memory_space<vmem>>, vector<1x1x12x128xbf16>
    %7 = vector.shape_cast %6 : vector<1x1x12x128xbf16> to vector<12x128xbf16>
    %c24 = arith.constant 24 : index
    %c0_12 = arith.constant 0 : index
    %8 = vector.load %arg7[%c24, %c0_12] : memref<36x128xbf16, #tpu.memory_space<vmem>>, vector<12x128xbf16>
    tpu.vector_store %arg7[%c24, %c0_12], %7 {strides = array<i32>} : memref<36x128xbf16, #tpu.memory_space<vmem>>, vector<12x128xbf16>,
    %c0_13 = arith.constant 0 : index
    %c0_14 = arith.constant 0 : index
    %9 = vector.load %arg2[%c0_13, %c0_14] : memref<8x36xbf16, #tpu.memory_space<vmem>>, vector<8x36xbf16>
    %c0_15 = arith.constant 0 : index
    %c0_16 = arith.constant 0 : index
    %10 = vector.load %arg7[%c0_15, %c0_16] : memref<36x128xbf16, #tpu.memory_space<vmem>>, vector<36x128xbf16>
    %cst = arith.constant dense<0.000000e+00> : vector<8x128xf32>
    %11 = tpu.matmul %9, %10, %cst {dimension_numbers = #tpu.dot_dimension_numbers<[1], [0], [0], [1], [0, 0, 1, 1], [], []>} : vector<8x36xbf16>, vector<36x128xbf16>, vector<8x128xf32> -> vector<8x128xf32>
    %c0_17 = arith.constant 0 : index
    %c0_18 = arith.constant 0 : index
    %12 = vector.load %arg4[%c0_17, %c0_18] : memref<8x1xf32, #tpu.memory_space<vmem>>, vector<8x1xf32>
    %13 = vector.broadcast %12 : vector<8x1xf32> to vector<8x128xf32>
    %14 = arith.mulf %11, %13 : vector<8x128xf32>
    %c0_19 = arith.constant 0 : index
    %c0_20 = arith.constant 0 : index
    %15 = vector.load %arg5[%c0_19, %c0_20] : memref<8x1xf32, #tpu.memory_space<vmem>>, vector<8x1xf32>
    %16 = vector.broadcast %15 : vector<8x1xf32> to vector<8x128xf32>
    %17 = arith.addf %14, %16 : vector<8x128xf32>
    %cst_21 = arith.constant 0.000000e+00 : f32
    %18 = vector.broadcast %cst_21 : f32 to vector<8x128xf32>
    %19 = arith.maximumf %17, %18 : vector<8x128xf32>
    %c0_22 = arith.constant 0 : index
    %c0_23 = arith.constant 0 : index
    %c0_24 = arith.constant 0 : index
    %20 = vector.load %arg6[%c0_22, %c0_23, %c0_24] : memref<1x8x128xf32, #tpu.memory_space<vmem>>, vector<1x8x128xf32>
    %21 = vector.shape_cast %20 : vector<1x8x128xf32> to vector<8x128xf32>
    %22 = vector.shape_cast %19 : vector<8x128xf32> to vector<1x8x128xf32>
    tpu.vector_store %arg6[%c0_22, %c0_23, %c0_24], %22 {strides = array<i32>} : memref<1x8x128xf32, #tpu.memory_space<vmem>>, vector<1x8x128xf32>,
    return
  }
  func.func @transform_0(%arg0: i32, %arg1: i32) -> (i32, i32) {
    %c0_i32 = arith.constant 0 : i32
    %c0_i32_0 = arith.constant 0 : i32
    %c0_i32_1 = arith.constant 0 : i32
    return %c0_i32, %c0_i32_0 : i32, i32
  }
  func.func @transform_1(%arg0: i32, %arg1: i32) -> (i32, i32, i32, i32) {
    %c0_i32 = arith.constant 0 : i32
    %c0_i32_0 = arith.constant 0 : i32
    %c0_i32_1 = arith.constant 0 : i32
    return %arg0, %arg1, %c0_i32, %c0_i32_0 : i32, i32, i32, i32
  }
  func.func @transform_2(%arg0: i32, %arg1: i32) -> (i32, i32) {
    %c0_i32 = arith.constant 0 : i32
    %c0_i32_0 = arith.constant 0 : i32
    %c0_i32_1 = arith.constant 0 : i32
    return %c0_i32, %c0_i32_0 : i32, i32
  }
  func.func @transform_3(%arg0: i32, %arg1: i32) -> (i32, i32) {
    %c0_i32 = arith.constant 0 : i32
    %c0_i32_0 = arith.constant 0 : i32
    %c0_i32_1 = arith.constant 0 : i32
    return %c0_i32, %c0_i32_0 : i32, i32
  }
  func.func @transform_4(%arg0: i32, %arg1: i32) -> (i32, i32, i32) {
    %c0_i32 = arith.constant 0 : i32
    %c0_i32_0 = arith.constant 0 : i32
    return %arg0, %c0_i32, %arg1 : i32, i32, i32
  }
}

</mosaic_0001>

<bundles_post_ra>
// kernel: conv_block_forward.2
= control target key start
LH: loop header
LB: loop body
LE: loop exit
PB: predicated region body
PF: predicated region fallthrough
CT: control target
= control target key end

     0   :  { %s588_s12 = smov 0   ;;  %s590_s13 = smov 0   ;;  %s657_s0 = inlined_call_operand.vmem [shape: bf16[8,36], index: 0, kind: input, shape index: {}]   ;;  %s658_s1 = inlined_call_operand.vmem [shape: bf16[2,2,12,192], index: 1, kind: input, shape index: {}]   ;;  %s659_s2 = inlined_call_operand.vmem [shape: f32[2,8,1], index: 2, kind: output, shape index: {0}]   ;;  %s660_s3 = inlined_call_operand.vmem [shape: f32[2,8,1], index: 3, kind: output, shape index: {1}]  }
   0x1   :  { %s592_s14 = smov 0   ;;  %s594_s15 = smov 0  }
   0x2   :  { %s596_s16 = smov 0  }
   0x3 LB: > { %s23_s17 = sadd.s32 1, %s553_s14  ;;  %s26_s18 = sadd.s32 1, %s557_s15  ;;  %s561_s16 = sphi %s596_s16, %s14_s16   ;;  %s557_s15 = sphi %s594_s15, %s664_s15   ;;  %s553_s14 = sphi %s592_s14, %s663_s14   ;;  %s549_s13 = sphi %s590_s13, %s662_s13   ;;  %s545_s12 = sphi %s588_s12, %s661_s12  }
   0x4   : > { %p24_p0 = scmp.ge.s32.totalorder %s23_s17, 2  ;;  %p448_p1 = scmp.ge.s32.totalorder %s561_s16, 1 }
   0x5   : > { %p158_p2 = scmp.lt.s32.totalorder %s561_s16, 5 }
   0x6   : > { %s666_s17 = smov (%p24_p0, %s23_s17), 0  ;;  %s668_s18 = smov (!%p24_p0, %s26_s18), %s557_s15 }
   0x7   : > { %p159_p3 = pnand %p448_p1, %p158_p2  ;;  %p28_p4 = scmp.ge.s32.totalorder %s668_s18, 2 }
   0x8   : > { %p189_p5 = scmp.lt.s32.totalorder (!%p159_p3), %s549_s13, 1  ;;  %p191_p6 = scmp.lt.s32.totalorder (!%p159_p3), %s545_s12, 1 }
   0x9   : > { %s670_s18 = smov (%p28_p4, %s668_s18), 0  ;;  %162 = sbr.rel (%p159_p3) target bundleno = 522 (0x20a), region = 28 }
   0xa   : > { %p454_p7 = scmp.ne.s32.totalorder (!%p159_p3), %s545_s12, 0 }
  0x10   : > { %s672_s13 = smov (!%p189_p5, %s549_s13), 1  ;;  %210 = sbr.rel (%p454_p7) target bundleno = 23 (0x17), region = 32 }
  0x11   : > { %s192_s19 = scalar_select %p191_p6, %s545_s12, 1 }
  0x12   : > { %s450_s20 = sshll.u32 %s672_s13, 3  ;;  %vm211_vm0 = vcmask (!%p454_p7), 7168   ;;  %v563_v0 = vmov (!%p454_p7), 0.0  }
  0x13   : > { %s449_s21 = sshll.u32 %s192_s19, 2  ;;  %s621_s24 = scalar_lea.vmem %s659_s2, %s450_s20 }
  0x14   : > { %s195_s25 = sadd.s32 %s450_s20, %s449_s21  ;;  %s626_s28 = scalar_lea.vmem %s660_s3, %s450_s20  ;;  %212 = vst.msk [vmem:[%s621_s24] sm:$0xff] (!%p454_p7), %vm211_vm0, %v563_v0 }
  0x15   : > { %s451_s29 = sshll.u32 %s195_s25, 2  ;;  %213 = vst.msk [vmem:[%s626_s28] sm:$0xff] (!%p454_p7), %vm211_vm0, %v563_v0 }
  0x16   : > { %s197_s5 = scalar_lea.vmem %s658_s1, %s451_s29 }
  0x17 PF: > { %v218_v1 = vld [vmem:[%s197_s5] sm:$0xff]  ;;  %v219_v2 = vld [vmem:[%s197_s5 + $0x8] sm:$0x33]  ;;  %vm222_vm1 = vcmask 1041408   ;;  %s564_s6 = smov 64   ;;  %vm223_vm2 = vcmask 1045508  }
  0x18   : > { %v225_v3 = vrot.slane %v218_v1, 6  ;;  %246 = vrot.lane.b32.xlu1 %v218_v1, %s564_s6  ;;  %v227_v4 = vrot.slane %v219_v2, 6  ;;  %v243_v5 = vld [vmem:[%s197_s5 + $0x8] sm:$0x33]  ;;  %vm224_vm3 = vmor %vm222_vm1, %vm223_vm2  ;;  %v214_v6 = vld [vmem:[%s197_s5] sm:$0xf] }
  0x19   : > { %v215_v7 = vld [vmem:[%s197_s5 + $0x8] sm:$0x3]  ;;  %s565_s7 = smov 96   ;;  %v566_v9 = vmov 0.0   ;;  %216 = vst [vmem:[#allocation2] sm:$0xf] %v214_v6 }
  0x1a   : > { %229 = vrot.lane.b32.xlu0 %v225_v3, %s565_s7  ;;  %v226_v8 = vrot.slane %v225_v3, 4  ;;  %465 = vmatprep.subr.bf16.mxu0 %v566_v9  ;;  %217 = vst [vmem:[#allocation2 + $0x4] sm:$0x3] %v215_v7  ;;  %vm567_vm4 = vmmov 0   ;;  %vm252_vm5 = vcmask 523264   ;;  %vm235_vm6 = vcmask 785408  }
  0x1b   : > { %471 = vmatprep.mubr.msk.bf16.mxu0 %vm567_vm4, %v566_v9  ;;  %v259_v27 = vld [vmem:[%s657_s0] sm:$0xf]  ;;  %vm280_vm7 = vcmask 293888   ;;  %vm332_vm8 = vcmask 7168  }
  0x1c   : > { %v228_v10 = vsel %vm224_vm3, %v226_v8, %v227_v4  ;;  %248 = vrot.lane.b32.xlu1 %v243_v5, %s564_s6  ;;  %v328_v33 = vld [vmem:[%s621_s24] sm:$0xff] }
  0x1d   : > { %v334_v35 = vld [vmem:[%s626_s28] sm:$0xff] }
  0x1e   : > { %231 = vrot.lane.b32.xlu0 %v228_v10, %s565_s7 }
  0x8a   : > { %v247_v11 = vpop.permute.xlu1 %246 }
  0x8b   : > { %v250_v12 = vrot.slane %v247_v11, 4 }
  0x8c   : > { %v230_v13 = vpop.permute.xlu0 %229 }
  0x8d   : > { %v233_v14 = vrot.slane %v230_v13, 4  ;;  %v253_v15 = vsel %vm252_vm5, %v247_v11, %v250_v12 }
  0x8e   : > { %257 = vst [vmem:[#allocation2 + $0xc] sm:$0xf] %v253_v15  ;;  %v249_v16 = vpop.permute.xlu1 %248 }
  0x8f   : > { %v236_v17 = vsel %vm235_vm6, %v230_v13, %v233_v14  ;;  %v251_v18 = vrot.slane %v249_v16, 4 }
  0x90   : > { %240 = vst [vmem:[#allocation2 + $0x4] sm:$0xc] %v236_v17  ;;  %v232_v19 = vpop.permute.xlu0 %231 }
  0x91   : > { %v234_v20 = vrot.slane %v232_v19, 4  ;;  %v254_v21 = vsel %vm252_vm5, %v249_v16, %v251_v18 }
  0x92   : > { %258 = vst [vmem:[#allocation2 + $0x10] sm:$0x3] %v254_v21 }
  0x93   : > { %v237_v22 = vsel %vm235_vm6, %v232_v19, %v234_v20 }
  0x94   : > { %241 = vst [vmem:[#allocation2 + $0x8] sm:$0xf] %v237_v22 }
  0x97   : > { %v520_v23 = vld [vmem:[#allocation2] sm:$0xff]  }
  0x98   : > { %466 = vmatpush3.bf16.msra.mxu0 %v520_v23 }
  0x99   : > { %467 = vmatprep.subr.bf16.mxu0 %v566_v9  ;;  %v522_v25 = vld [vmem:[#allocation2 + $0x10] ss:$0 sps:$4 sm:$0x33]  }
  0x9a   : > { %v286_v26 = vsel %vm222_vm1, %v522_v25, 0 }
  0x9b   : > { %v521_v24 = vld [vmem:[#allocation2 + $0x8] sm:$0xff]  }
  0x9c   : > { %468 = vmatpush3.bf16.msra.mxu0 %v521_v24 }
  0x9d   : > { %469 = vmatprep.subr.bf16.mxu0 %v566_v9 }
  0xa0   : > { %470 = vmatpush3.bf16.msra.mxu0 %v286_v26 }
  0xa3   : > { %472 = vmatmul.mubr.msk.bf16.vlgmr.msra.gmra.mrb[0].mxu0 %vm280_vm7, %v259_v27 }
 0x176   : > { %v322_v28 = vpop.f32.mrb[0].mxu0 }
 0x177   : > { %329 = vadd.xlane.f32.xlu0 %v322_v28  ;;  %v473_v29 = vpop.f32.mrb[1].mxu0  ;;  %v335_v30 = vmul.f32 %v322_v28, %v322_v28 }
 0x178   : > { %v325_v31 = vpop.f32.mrb[2].mxu0 }
 0x179   : > { %336 = vadd.xlane.f32.xlu1 %v335_v30  ;;  %v474_v32 = vpop.f32.mrb[3].mxu0 }
 0x204   : > { %v330_v34 = vpop.xlane.xlu0 %329 }
 0x205   : > { %v331_v36 = vadd.f32 %v330_v34, %v328_v33 }
 0x206   : > { %v337_v37 = vpop.xlane.xlu1 %336 }
 0x207   : > { %333 = vst.msk [vmem:[%s621_s24] sm:$0xff] %vm332_vm8, %v331_v36  ;;  %v338_v38 = vadd.f32 %v337_v37, %v334_v35 }
 0x209   : > { %339 = vst.msk [vmem:[%s626_s28] sm:$0xff] %vm332_vm8, %v338_v38 }
 0x20a PF: > { %s14_s16 = sadd.s32 1, %s561_s16   ;;  %s661_s12 = smov %s553_s14 }
 0x20b   : > { %p11_p8 = scmp.ge.s32.totalorder %s14_s16, 6   ;;  %s662_s13 = smov %s557_s15 }
 0x20c   : > { %s663_s14 = smov %s666_s17  ;;  %s664_s15 = smov %s670_s18 }
 0x20d   :  { %13 = sbr.rel (!%p11_p8) target bundleno = 3 (0x3), region = 74 }

// kernel: conv_block_forward.3
= control target key start
LH: loop header
LB: loop body
LE: loop exit
PB: predicated region body
PF: predicated region fallthrough
CT: control target
= control target key end

     0   :  { %s602_s15 = smov 0   ;;  %s604_s16 = smov 0   ;;  %s672_s0 = inlined_call_operand.vmem [shape: bf16[8,36], index: 0, kind: input, shape index: {}]   ;;  %s673_s1 = inlined_call_operand.vmem [shape: bf16[2,2,12,192], index: 1, kind: input, shape index: {}]   ;;  %s674_s2 = inlined_call_operand.vmem [shape: f32[8,1], index: 2, kind: input, shape index: {}]   ;;  %s675_s3 = inlined_call_operand.vmem [shape: f32[8,1], index: 3, kind: input, shape index: {}]   ;;  %s676_s4 = inlined_call_operand.vmem [shape: f32[2,8,256], index: 4, kind: output, shape index: {}]  }
   0x1   :  { %s606_s17 = smov 0   ;;  %s608_s18 = smov 0  }
   0x2   :  { %s610_s19 = smov 0  }
   0x3 LB: > { %s23_s20 = sadd.s32 1, %s562_s17  ;;  %s26_s21 = sadd.s32 1, %s566_s18  ;;  %s570_s19 = sphi %s610_s19, %s14_s19   ;;  %s566_s18 = sphi %s608_s18, %s680_s18   ;;  %s562_s17 = sphi %s606_s17, %s679_s17   ;;  %s558_s16 = sphi %s604_s16, %s678_s16   ;;  %s554_s15 = sphi %s602_s15, %s677_s15  }
   0x4   : > { %p24_p0 = scmp.ge.s32.totalorder %s23_s20, 2  ;;  %p456_p1 = scmp.ge.s32.totalorder %s570_s19, 1 }
   0x5   : > { %p182_p2 = scmp.lt.s32.totalorder %s570_s19, 5 }
   0x6   : > { %s682_s20 = smov (%p24_p0, %s23_s20), 0  ;;  %s684_s21 = smov (!%p24_p0, %s26_s21), %s566_s18 }
   0x7   : > { %p183_p3 = pnand %p456_p1, %p182_p2  ;;  %p28_p4 = scmp.ge.s32.totalorder %s684_s21, 2 }
   0x8   : > { %p215_p5 = scmp.lt.s32.totalorder (!%p183_p3), %s558_s16, 1  ;;  %p217_p6 = scmp.lt.s32.totalorder (!%p183_p3), %s554_s15, 1  ;;  %v572_v0 = vmov (!%p183_p3), 0.0   ;;  %vm241_vm0 = vcmask (!%p183_p3), 1041408   ;;  %vm242_vm1 = vcmask (!%p183_p3), 1045508   ;;  %vm575_vm3 = vmmov (!%p183_p3), 0  }
   0x9   : > { %s686_s21 = smov (%p28_p4, %s684_s21), 0  ;;  %186 = sbr.rel (%p183_p3) target bundleno = 380 (0x17c), region = 36 }
   0xa   : > { %472 = vmatprep.subr.bf16.mxu0 (!%p183_p3), %v572_v0  ;;  %s573_s29 = smov (!%p183_p3), 64   ;;  %vm243_vm2 = vmor (!%p183_p3), %vm241_vm0, %vm242_vm1  ;;  %s574_s30 = smov (!%p183_p3), 96   ;;  %478 = vmatprep.mubr.msk.bf16.mxu0 (!%p183_p3), %vm575_vm3, %v572_v0  ;;  %v347_v10 = vld [vmem:[%s674_s2] sm:$0xff] (!%p183_p3)  ;;  %v576_v12 = vmov (!%p183_p3), 0   ;;  %vm271_vm4 = vcmask (!%p183_p3), 523264   ;;  %vm254_vm5 = vcmask (!%p183_p3), 785408  }
   0xb   : > { %v354_v11 = vld [vmem:[%s675_s3] sm:$0xff] (!%p183_p3)  ;;  %527 = vset.pattern.permute.xlu0 (!%p183_p3), %v576_v12  ;;  %528 = vset.pattern.permute.xlu1 (!%p183_p3), %v576_v12  ;;  %vm299_vm6 = vcmask (!%p183_p3), 293888  }
   0xc   : > { %v278_v29 = vld [vmem:[%s672_s0] sm:$0xf] (!%p183_p3) }
  0x10   : > { %s688_s16 = smov (!%p215_p5, %s558_s16), 1  ;;  %s690_s15 = smov (!%p217_p6, %s554_s15), 1 }
  0x11   : > { %s458_s22 = sshll.u32 %s688_s16, 3  ;;  %s457_s23 = sshll.u32 %s690_s15, 2 }
  0x12   : > { %s221_s24 = sadd.s32 %s458_s22, %s457_s23  ;;  %s460_s11 = sshll.u32 %s688_s16, 1 }
  0x13   : > { %s459_s25 = sshll.u32 %s221_s24, 2  ;;  %s229_s12 = sadd.s32 %s460_s11, %s690_s15 }
  0x14   : > { %s223_s28 = scalar_lea.vmem %s673_s1, %s459_s25  ;;  %s461_s13 = sshll.u32 %s229_s12, 3 }
  0x15   : > { %v237_v1 = vld [vmem:[%s223_s28] sm:$0xff]  ;;  %v234_v3 = vld [vmem:[%s223_s28 + $0x8] sm:$0x3]  ;;  %s231_s23 = scalar_lea.vmem %s676_s4, %s461_s13 }
  0x16   : > { %v233_v2 = vld [vmem:[%s223_s28] sm:$0xf]  ;;  %v244_v4 = vrot.slane %v237_v1, 6  ;;  %236 = vst [vmem:[#allocation2 + $0x4] sm:$0x3] %v234_v3  ;;  %265 = vrot.lane.b32.xlu1 %v237_v1, %s573_s29 }
  0x17   : > { %235 = vst [vmem:[#allocation2] sm:$0xf] %v233_v2  ;;  %v238_v5 = vld [vmem:[%s223_s28 + $0x8] sm:$0x33] }
  0x18   : > { %v246_v6 = vrot.slane %v238_v5, 6  ;;  %v262_v7 = vld [vmem:[%s223_s28 + $0x8] sm:$0x33]  ;;  %248 = vrot.lane.b32.xlu0 %v244_v4, %s574_s30  ;;  %v245_v8 = vrot.slane %v244_v4, 4 }
  0x1a   : > { %v247_v9 = vsel %vm243_vm2, %v245_v8, %v246_v6  ;;  %267 = vrot.lane.b32.xlu1 %v262_v7, %s573_s29 }
  0x1c   : > { %250 = vrot.lane.b32.xlu0 %v247_v9, %s574_s30 }
  0x1e   : > { %357 = vperm.xlu1 %528, %v354_v11  }
  0x20   : > { %350 = vperm.xlu0 %527, %v347_v10  }
  0x88   : > { %v266_v13 = vpop.permute.xlu1 %265 }
  0x89   : > { %v269_v14 = vrot.slane %v266_v13, 4 }
  0x8a   : > { %v249_v15 = vpop.permute.xlu0 %248 }
  0x8b   : > { %v252_v16 = vrot.slane %v249_v15, 4  ;;  %v272_v17 = vsel %vm271_vm4, %v266_v13, %v269_v14 }
  0x8c   : > { %276 = vst [vmem:[#allocation2 + $0xc] sm:$0xf] %v272_v17  ;;  %v268_v18 = vpop.permute.xlu1 %267 }
  0x8d   : > { %v255_v19 = vsel %vm254_vm5, %v249_v15, %v252_v16  ;;  %v270_v20 = vrot.slane %v268_v18, 4 }
  0x8e   : > { %259 = vst [vmem:[#allocation2 + $0x4] sm:$0xc] %v255_v19  ;;  %v251_v21 = vpop.permute.xlu0 %250 }
  0x8f   : > { %v253_v22 = vrot.slane %v251_v21, 4  ;;  %v273_v23 = vsel %vm271_vm4, %v268_v18, %v270_v20 }
  0x90   : > { %277 = vst [vmem:[#allocation2 + $0x10] sm:$0x3] %v273_v23 }
  0x91   : > { %v256_v24 = vsel %vm254_vm5, %v251_v21, %v253_v22 }
  0x92   : > { %260 = vst [vmem:[#allocation2 + $0x8] sm:$0xf] %v256_v24 }
  0x95   : > { %v529_v25 = vld [vmem:[#allocation2] sm:$0xff]  }
  0x96   : > { %473 = vmatpush3.bf16.msra.mxu0 %v529_v25 }
  0x97   : > { %474 = vmatprep.subr.bf16.mxu0 %v572_v0  ;;  %v531_v27 = vld [vmem:[#allocation2 + $0x10] ss:$0 sps:$4 sm:$0x33]  }
  0x98   : > { %v305_v28 = vsel %vm241_vm0, %v531_v27, 0 }
  0x99   : > { %v530_v26 = vld [vmem:[#allocation2 + $0x8] sm:$0xff]  }
  0x9a   : > { %475 = vmatpush3.bf16.msra.mxu0 %v530_v26 }
  0x9b   : > { %476 = vmatprep.subr.bf16.mxu0 %v572_v0 }
  0x9d   : > { %v358_v32 = vpop.permute.xlu1 %357 }
  0x9e   : > { %477 = vmatpush3.bf16.msra.mxu0 %v305_v28 }
  0x9f   : > { %v351_v30 = vpop.permute.xlu0 %350 }
  0xa1   : > { %479 = vmatmul.mubr.msk.bf16.vlgmr.msra.gmra.mrb[0].mxu0 %vm299_vm6, %v278_v29 }
 0x174   : > { %v341_v31 = vpop.f32.mrb[0].mxu0 }
 0x175   : > { %v353_v33 = vmul.f32 %v351_v30, %v341_v31  ;;  %v480_v34 = vpop.f32.mrb[1].mxu0 }
 0x176   : > { %v344_v35 = vpop.f32.mrb[2].mxu0 }
 0x177   : > { %v360_v36 = vadd.f32 %v358_v32, %v353_v33  ;;  %v481_v37 = vpop.f32.mrb[3].mxu0 }
 0x179   : > { %v361_v38 = vmax.f32 %v360_v36, 0.0 }
 0x17b   : > { %362 = vst [vmem:[%s231_s23] sm:$0xff] %v361_v38 }
 0x17c PF: > { %s14_s19 = sadd.s32 1, %s570_s19   ;;  %s677_s15 = smov %s562_s17 }
 0x17d   : > { %p11_p7 = scmp.ge.s32.totalorder %s14_s19, 6   ;;  %s678_s16 = smov %s566_s18 }
 0x17e   : > { %s679_s17 = smov %s682_s20  ;;  %s680_s18 = smov %s686_s21 }
 0x17f   :  { %13 = sbr.rel (!%p11_p7) target bundleno = 3 (0x3), region = 66 }

</bundles_post_ra>
